<compile_context>
chip_gen: v6e
topology: v6e:2x2x1
jax: 0.10.0
libtpu: 0.0.40
codegen_flags: <defaults>
</compile_context>

<pallas_src>
import functools

import numpy as np
import jax
import jax.numpy as jnp
from jax.experimental import pallas as pl
from jax.experimental.pallas import tpu as pltpu


_TAPS3 = tuple((dy, dx) for dy in range(3) for dx in range(3))   # t = dy*3 + dx
_TAPS2 = ((0, 0), (0, 1), (1, 0), (1, 1))                        # k = p*2 + q


# ---------------------------------------------------------------------------
# pltpu.roll direction probe (runs once; makes the shift math convention-proof)
# ---------------------------------------------------------------------------
def _roll_probe_kernel(x_ref, o_ref):
    o_ref[...] = pltpu.roll(x_ref[...], shift=1, axis=1)


def detect_roll_is_jnp():
    x = jnp.tile(jnp.arange(256, dtype=jnp.float32)[None, :], (8, 1))
    y = pl.pallas_call(
        _roll_probe_kernel,
        out_shape=jax.ShapeDtypeStruct((8, 256), jnp.float32),
        in_specs=[pl.BlockSpec(memory_space=pltpu.MemorySpace.VMEM)],
        out_specs=pl.BlockSpec(memory_space=pltpu.MemorySpace.VMEM),
    )(x)
    v = float(y[0, 0])
    if v == 255.0:
        return True      # out[i] = in[(i - shift) % n]   (jnp.roll convention)
    if v == 1.0:
        return False     # out[i] = in[(i + shift) % n]
    raise RuntimeError(f"unexpected pltpu.roll semantics (probe value {v})")


# ---------------------------------------------------------------------------
# Static plan (channel / size / spacing / crop bookkeeping, all Python ints)
# ---------------------------------------------------------------------------
def build_plan(in_channels, deepness, starting_multiplier, spatial):
    w_f = spatial
    p_valid = spatial * spatial
    length = ((p_valid + 127) // 128) * 128

    dc = [[starting_multiplier * 2 ** i, starting_multiplier * 2 ** (i + 1)]
          for i in range(-1, deepness)]
    uc = [[j, i] for i, j in dc[::-1]]
    dc[0][0] = in_channels

    # encoder outputs: (conceptual size, fine-grid spacing, channels)
    down_meta = []
    size, sigma = spatial - 4, 1
    assert size > 0
    down_meta.append((size, sigma, int(dc[0][1])))
    for i in range(deepness):
        assert size % 2 == 0 and size // 2 - 4 > 0
        size = size // 2 - 4
        sigma *= 2
        down_meta.append((size, sigma, int(dc[i + 1][1])))

    # decoder
    up_meta = []
    cur_size, cur_sigma, cur_ch = down_meta[-1]
    skips = down_meta[:-1][::-1]
    for i, (ins, outs) in enumerate(uc[:-1]):
        ins, outs = int(ins), int(outs)
        up_size = cur_size * 2
        up_sigma = cur_sigma // 2
        skip_size, skip_sigma, skip_ch = skips[i]
        assert skip_sigma == up_sigma and skip_ch + outs == ins
        crop = (skip_size - up_size) // 2
        assert crop >= 0 and up_size - 4 > 0
        up_meta.append(dict(cin=ins, cout=outs, sigma=up_sigma,
                            skip_ch=skip_ch,
                            crop_shift=up_sigma * (crop * w_f + crop)))
        cur_size, cur_sigma, cur_ch = up_size - 4, up_sigma, outs

    head_cin = int(uc[-2][1])
    assert head_cin == cur_ch
    return dict(W_f=w_f, L=length, P_valid=p_valid,
                down_channels=dc, up_channels=uc,
                down_meta=down_meta, up_meta=up_meta,
                out_size=cur_size, head_cin=head_cin)


# ---------------------------------------------------------------------------
# Parameters (PyTorch layouts) and one-time packing into kernel-ready matrices
# ---------------------------------------------------------------------------
def _init_conv(key, cout, cin, k):
    k1, k2 = jax.random.split(key)
    w = jax.random.normal(k1, (cout, cin, k, k), jnp.float32) * 0.1
    b = jax.random.normal(k2, (cout,), jnp.float32) * 0.1
    return w, b


def _init_convT(key, cin, cout, k):
    k1, k2 = jax.random.split(key)
    w = jax.random.normal(k1, (cin, cout, k, k), jnp.float32) * 0.1
    b = jax.random.normal(k2, (cout,), jnp.float32) * 0.1
    return w, b


def _init_double_conv(key, cin, cout):
    k1, k2 = jax.random.split(key)
    w1, b1 = _init_conv(k1, cout, cin, 3)
    w2, b2 = _init_conv(k2, cout, cout, 3)
    return {"w1": w1, "b1": b1, "w2": w2, "b2": b2}


def build_unet_params(key, in_channels, deepness, starting_multiplier):
    dc = [[starting_multiplier * 2 ** i, starting_multiplier * 2 ** (i + 1)]
          for i in range(-1, deepness)]
    uc = [[j, i] for i, j in dc[::-1]]
    dc[0][0] = in_channels

    keys = jax.random.split(key, 2 + deepness + len(uc[:-1]))
    ki = iter(range(len(keys)))

    params = {}
    params["in_conv"] = _init_double_conv(keys[next(ki)], int(dc[0][0]), int(dc[0][1]))
    params["downs"] = [_init_double_conv(keys[next(ki)], int(i_), int(o_))
                       for i_, o_ in dc[1:]]
    ups = []
    for ins, outs in uc[:-1]:
        ka, kb = jax.random.split(keys[next(ki)])
        wt, bt = _init_convT(ka, int(ins), int(outs), 2)
        ups.append({"wt": wt, "bt": bt,
                    "conv": _init_double_conv(kb, int(ins), int(outs))})
    params["ups"] = ups
    w_out, b_out = _init_conv(keys[next(ki)], 1, int(uc[-2][1]), 1)
    params["conv_out_w"] = w_out
    params["conv_out_b"] = b_out
    return params


def _pack_conv3x3(w):                      # torch (Cout,Cin,3,3) -> (9,Cout,Cin)
    cout, cin = w.shape[0], w.shape[1]
    return jnp.transpose(w, (2, 3, 0, 1)).reshape(9, cout, cin)


def _pack_convT2x2(w):                     # torch (Cin,Cout,2,2) -> (4,Cout,Cin)
    cin, cout = w.shape[0], w.shape[1]
    return jnp.transpose(w, (2, 3, 1, 0)).reshape(4, cout, cin)


def _pack_bias(b):
    return b.reshape(-1, 1).astype(jnp.float32)


def _parity_masks(w_f, length, sigma):
    p_idx = np.arange(length)
    y, x = p_idx // w_f, p_idx % w_f
    yp, xp = (y // sigma) % 2, (x // sigma) % 2
    masks = np.stack([(yp == p) & (xp == q) for (p, q) in _TAPS2]).astype(np.float32)
    return jnp.asarray(masks)              # (4, L)


def pack_unet_params(params, plan):
    """Pre-pack torch-layout params into kernel-ready matrices (done once)."""
    deepness = len(plan["down_meta"]) - 1
    flat = []
    p = params["in_conv"]
    flat += [_pack_conv3x3(p["w1"]), _pack_bias(p["b1"]),
             _pack_conv3x3(p["w2"]), _pack_bias(p["b2"])]
    for i in range(deepness):
        p = params["downs"][i]
        flat += [_pack_conv3x3(p["w1"]), _pack_bias(p["b1"]),
                 _pack_conv3x3(p["w2"]), _pack_bias(p["b2"])]
    for i, meta in enumerate(plan["up_meta"]):
        up = params["ups"][i]
        cup = meta["cout"]
        w1 = up["conv"]["w1"]              # (cout, cup + skip_ch, 3, 3)
        flat += [
            _pack_convT2x2(up["wt"]), _pack_bias(up["bt"]),
            _parity_masks(plan["W_f"], plan["L"], meta["sigma"]),
            _pack_conv3x3(w1[:, :cup]),    # acts on the up-sampled half
            _pack_conv3x3(w1[:, cup:]),    # acts on the (cropped) skip half
            _pack_bias(up["conv"]["b1"]),
            _pack_conv3x3(up["conv"]["w2"]), _pack_bias(up["conv"]["b2"]),
        ]
    flat += [params["conv_out_w"].reshape(1, -1).astype(jnp.float32),
             _pack_bias(params["conv_out_b"])]
    return flat


# ---------------------------------------------------------------------------
# Fused UNet kernel + forward wrapper
# ---------------------------------------------------------------------------
def make_unet_forward(plan, in_channels, roll_is_jnp):
    w_f, length = plan["W_f"], plan["L"]
    down_meta, up_meta = plan["down_meta"], plan["up_meta"]
    deepness = len(down_meta) - 1
    n_ups = len(up_meta)

    def shift_fwd(x, s):
        # out[:, p] = x[:, (p + s) mod L].  Wrapped lanes only ever land on
        # invalid-margin / padding positions, never on a valid fine-grid point.
        s = s % length
        if s == 0:
            return x
        amt = (-s) % length if roll_is_jnp else s
        return pltpu.roll(x, shift=amt, axis=1)

    def conv3x3(x, w_ref, b_ref, sigma):
        acc = None
        for t, (dy, dx) in enumerate(_TAPS3):
            xt = shift_fwd(x, sigma * (dy * w_f + dx))
            term = jnp.dot(w_ref[t], xt, preferred_element_type=jnp.float32)
            acc = term if acc is None else acc + term
        return acc + b_ref[...]

    def conv3x3_pair(xa, xb, wa_ref, wb_ref, b_ref, sigma, crop_shift):
        # 3x3 conv over the channel-concat [xa ; xb] without materialising the
        # concat; the centre-crop of the skip is folded into its roll offset.
        acc = None
        for t, (dy, dx) in enumerate(_TAPS3):
            s = sigma * (dy * w_f + dx)
            term = (jnp.dot(wa_ref[t], shift_fwd(xa, s),
                            preferred_element_type=jnp.float32)
                    + jnp.dot(wb_ref[t], shift_fwd(xb, s + crop_shift),
                              preferred_element_type=jnp.float32))
            acc = term if acc is None else acc + term
        return acc + b_ref[...]

    def maxpool2x2(x, sigma):
        out = x
        for (u, v) in ((0, 1), (1, 0), (1, 1)):
            out = jnp.maximum(out, shift_fwd(x, sigma * (u * w_f + v)))
        return out

    def convT2x2(x, wt_ref, bt_ref, mask_ref, sigma_out):
        acc = None
        for k, (p, q) in enumerate(_TAPS2):
            xt = shift_fwd(x, -sigma_out * (p * w_f + q))
            term = mask_ref[k:k + 1, :] * jnp.dot(
                wt_ref[k], xt, preferred_element_type=jnp.float32)
            acc = term if acc is None else acc + term
        return acc + bt_ref[...]

    def kernel(*refs):
        it = iter(refs)
        x_ref = next(it)
        in_conv_refs = [next(it) for _ in range(4)]
        down_refs = [[next(it) for _ in range(4)] for _ in range(deepness)]
        up_refs = [[next(it) for _ in range(8)] for _ in range(n_ups)]
        head_w_ref = next(it)
        head_b_ref = next(it)
        o_ref = next(it)
        skip_refs = [next(it) for _ in range(deepness)]

        def double_conv(x, w1, b1, w2, b2, sigma):
            h = jnp.maximum(conv3x3(x, w1, b1, sigma), 0.0)
            return jnp.maximum(conv3x3(h, w2, b2, sigma), 0.0)

        # -------- encoder --------
        sigma = 1
        cur = double_conv(x_ref[0], *in_conv_refs, sigma)
        if deepness > 0:
            skip_refs[0][...] = cur
        for i in range(deepness):
            pooled = maxpool2x2(cur, sigma)
            sigma *= 2
            cur = double_conv(pooled, *down_refs[i], sigma)
            if i < deepness - 1:
                skip_refs[i + 1][...] = cur

        # -------- decoder --------
        for i in range(n_ups):
            wt, bt, mask, w1a, w1b, b1, w2, b2 = up_refs[i]
            sigma //= 2
            up = convT2x2(cur, wt, bt, mask, sigma)
            skip = skip_refs[deepness - 1 - i][...]
            h = jnp.maximum(
                conv3x3_pair(up, skip, w1a, w1b, b1, sigma,
                             up_meta[i]["crop_shift"]), 0.0)
            cur = jnp.maximum(conv3x3(h, w2, b2, sigma), 0.0)

        # -------- head: 1x1 conv + sigmoid --------
        logits = jnp.dot(head_w_ref[...], cur,
                         preferred_element_type=jnp.float32) + head_b_ref[...]
        o_ref[0] = jax.nn.sigmoid(logits)

    def forward(flat_params, x_nchw):
        n, c, h, w = x_nchw.shape
        assert h == w_f and w == w_f
        # TODO(synk): positional_encoding='linear'/'sin' channel-append paths not
        # implemented; with positional_encoding=None the index select is identity.
        # TODO(synk): ThinConv2d is not defined in the reference; use_thin=False only.
        x = x_nchw[:, :in_channels]
        x = x.reshape(n, in_channels, h * w)
        x = jnp.pad(x, ((0, 0), (0, 0), (0, length - h * w)))

        in_specs = [pl.BlockSpec((1, in_channels, length), lambda i: (i, 0, 0))]
        for a in flat_params:
            in_specs.append(pl.BlockSpec(a.shape,
                                         lambda i, _nd=a.ndim: (0,) * _nd))
        out_spec = pl.BlockSpec((1, 1, length), lambda i: (i, 0, 0))
        scratch = [pltpu.VMEM((ch, length), jnp.float32)
                   for (_, _, ch) in down_meta[:-1]]

        out_full = pl.pallas_call(
            kernel,
            out_shape=jax.ShapeDtypeStruct((n, 1, length), jnp.float32),
            grid=(n,),
            in_specs=in_specs,
            out_specs=out_spec,
            scratch_shapes=scratch,
            compiler_params=pltpu.CompilerParams(
                dimension_semantics=("parallel",)),
        )(x, *flat_params)

        out = out_full[:, :, :plan["P_valid"]].reshape(n, 1, w_f, w_f)
        return out[:, :, :plan["out_size"], :plan["out_size"]]

    return jax.jit(forward)


# ---------------------------------------------------------------------------
# Pure-JAX reference (mirrors the PyTorch module) for numerical validation
# ---------------------------------------------------------------------------
def _ref_conv(x, w, b):
    y = jax.lax.conv_general_dilated(
        x, w, window_strides=(1, 1), padding="VALID",
        dimension_numbers=("NCHW", "OIHW", "NCHW"),
        precision=jax.lax.Precision.HIGHEST)
    return y + b.reshape(1, -1, 1, 1)


def _ref_double_conv(x, p):
    x = jax.nn.relu(_ref_conv(x, p["w1"], p["b1"]))
    x = jax.nn.relu(_ref_conv(x, p["w2"], p["b2"]))
    return x


def _ref_maxpool2x2(x):
    n, c, h, w = x.shape
    return jnp.max(x.reshape(n, c, h // 2, 2, w // 2, 2), axis=(3, 5))


def _ref_convT2x2(x, w, b):
    n, cin, h, wd = x.shape
    cout = w.shape[1]
    t = jnp.einsum("ncab,cdpq->ndapbq", x, w,
                   precision=jax.lax.Precision.HIGHEST)
    return t.reshape(n, cout, 2 * h, 2 * wd) + b.reshape(1, -1, 1, 1)


def ref_unet_forward(params, x, deepness):
    down_out = [_ref_double_conv(x, params["in_conv"])]
    for i in range(deepness):
        pooled = _ref_maxpool2x2(down_out[i])
        down_out.append(_ref_double_conv(pooled, params["downs"][i]))
    up_in = [down_out[-1]]
    rev = down_out[::-1]
    skips = rev[1:]
    for i, up_p in enumerate(params["ups"]):
        x1, x2 = up_in[i], skips[i]
        up = _ref_convT2x2(x1, up_p["wt"], up_p["bt"])
        ph = (x2.shape[2] - up.shape[2]) // 2
        pw = (x2.shape[3] - up.shape[3]) // 2
        x2c = x2[:, :, ph:ph + up.shape[2], pw:pw + up.shape[3]]
        con = jnp.concatenate([up, x2c], axis=1)
        up_in.append(_ref_double_conv(con, up_p["conv"]))
    out = _ref_conv(up_in[-1], params["conv_out_w"], params["conv_out_b"])
    return jax.nn.sigmoid(out)


# ---------------------------------------------------------------------------
if __name__ == "__main__":
    in_channels, deepness, starting_multiplier = 3, 2, 4
    batch, spatial = 2, 44                       # 44 -> valid UNet sizes

    key = jax.random.PRNGKey(0)
    kp, kx = jax.random.split(key)
    params = build_unet_params(kp, in_channels, deepness, starting_multiplier)
    x = jax.random.normal(kx, (batch, in_channels, spatial, spatial), jnp.float32)

    plan = build_plan(in_channels, deepness, starting_multiplier, spatial)
    roll_is_jnp = detect_roll_is_jnp()
    flat_params = pack_unet_params(params, plan)
    forward = make_unet_forward(plan, in_channels, roll_is_jnp)

    out = jax.block_until_ready(forward(flat_params, x))

    assert out.shape == (batch, 1, plan["out_size"], plan["out_size"]), out.shape
    assert bool(jnp.all(jnp.isfinite(out)))
    assert bool(jnp.all((out >= 0.0) & (out <= 1.0)))     # sigmoid output

    ref = jax.block_until_ready(ref_unet_forward(params, x, deepness))
    assert ref.shape == out.shape
    max_err = float(jnp.max(jnp.abs(out - ref)))
    assert max_err < 1e-2, f"kernel/reference mismatch: {max_err}"

    print("KERNEL_OK")
</pallas_src>

<mosaic_0001>
module attributes {stable_mosaic.version = 11 : i64} {
  func.func @_roll_probe_kernel(%arg0: memref<8x256xf32, #tpu.memory_space<vmem>>, %arg1: memref<8x256xf32, #tpu.memory_space<vmem>>) attributes {dimension_semantics = [], scalar_prefetch = 0 : i64, scratch_operands = 0 : i64, tpu.core_type = #tpu.core_type<tc>} {
    %c0 = arith.constant 0 : index
    %c0_0 = arith.constant 0 : index
    %0 = vector.load %arg0[%c0, %c0_0] : memref<8x256xf32, #tpu.memory_space<vmem>>, vector<8x256xf32>
    %c1_i32 = arith.constant 1 : i32
    %1 = tpu.dynamic_rotate %0 by %c1_i32 dim 1 : vector<8x256xf32>, i32 -> vector<8x256xf32>
    %c0_1 = arith.constant 0 : index
    %c0_2 = arith.constant 0 : index
    %2 = vector.load %arg1[%c0_1, %c0_2] : memref<8x256xf32, #tpu.memory_space<vmem>>, vector<8x256xf32>
    tpu.vector_store %arg1[%c0_1, %c0_2], %1 {strides = array<i32>} : memref<8x256xf32, #tpu.memory_space<vmem>>, vector<8x256xf32>,
    return
  }
}

</mosaic_0001>

<bundles_post_ra>
// kernel: tpu_custom_call.1
= control target key start
LH: loop header
LB: loop body
LE: loop exit
PB: predicated region body
PF: predicated region fallthrough
CT: control target
= control target key end

     0   :  { %6 = vsyncpa [#allocation3], 0  ;;  %s115_s0 = inlined_call_operand.hbm [shape: f32[8,256], index: 0, kind: input, shape index: {}]   ;;  %s116_s1 = inlined_call_operand.hbm [shape: f32[8,256], index: 1, kind: output, shape index: {}]  }
   0x1   :  { %7 = vsyncpa [#allocation4], 0  ;;  %s96_s6 = smov [#allocation2]  }
   0x2   :  { %s14_s7 = sshll.u32 %s96_s6, 4  ;;  %s15_s7 = int_to_ptr.vmem [resolvable:$true] %s14_s7 }
   0x3   :  { %s60_s8 = scalar_lea.vmem %s15_s7, 256  ;;  %p65_p1 = scmp.lt.s32.totalorder %s15_s7, %s15_s7 }
   0x4   :  { %p61_p0 = scmp.ne.s32.totalorder %s15_s7, %s60_s8  ;;  %p66_p2 = scmp.lt.s32.totalorder %s60_s8, %s60_s8 }
   0x6   :  { %p67_p3 = por %p66_p2, %p65_p1 }
   0x8   :  { %p68_p4 = pnand %p67_p3, %p61_p0 }
   0xa   :  { %71 = shalt.err (!%p68_p4)
}
   0xb   :  { %17 = dma.hbm_to_vmem [thread:$0]  %s115_s0, 256, %s15_s7, [#allocation3]  }
   0xc   :  { %92 = dma.done.wait [#allocation3], 256  }
   0xd   :  { %93 = vsyncadd [#allocation3], 4294967040  ;;  %v21_v0 = vld [vmem:[#allocation2] sm:$0xff]  ;;  %s97_s11 = smov 1   ;;  %v22_v1 = vld [vmem:[#allocation2 + $0x8] sm:$0xff]  ;;  %v27_v2 = vlaneseq  ;;  %s98_s12 = smov [#allocation5]  }
   0xe   :  { %23 = vrot.lane.b32.xlu0 %v21_v0, %s97_s11  ;;  %s40_s13 = sshll.u32 %s98_s12, 4  ;;  %s41_s13 = int_to_ptr.vmem [resolvable:$true] %s40_s13 }
   0xf   :  { %v28_v3 = vand.u32 127, %v27_v2  ;;  %s72_s0 = scalar_lea.vmem %s41_s13, 256  ;;  %p77_p6 = scmp.lt.s32.totalorder %s41_s13, %s41_s13 }
  0x10   :  { %p73_p5 = scmp.ne.s32.totalorder %s41_s13, %s72_s0  ;;  %p78_p7 = scmp.lt.s32.totalorder %s72_s0, %s72_s0 }
  0x11   :  { %vm29_vm0 = vcmp.lt.s32.totalorder %v28_v3, 1 }
  0x12   :  { %25 = vrot.lane.b32.xlu0 %v22_v1, %s97_s11  ;;  %p79_p8 = por %p78_p7, %p77_p6 }
  0x14   :  { %p80_p9 = pnand %p79_p8, %p73_p5 }
  0x80   :  { %v24_v4 = vpop.permute.xlu0 %23 }
  0x84   :  { %v26_v5 = vpop.permute.xlu0 %25 }
  0x85   :  { %v30_v6 = vsel %vm29_vm0, %v24_v4, %v26_v5  ;;  %v31_v7 = vsel %vm29_vm0, %v26_v5, %v24_v4 }
  0x86   :  { %32 = vst [vmem:[#allocation5] sm:$0xff] %v31_v7  ;;  %33 = vst [vmem:[#allocation5 + $0x8] sm:$0xff] %v30_v6 }
  0x87   :  { %83 = shalt.err (!%p80_p9)
}
  0x88   :  { %43 = dma.vmem_to_hbm [thread:$0]  %s41_s13, 256, %s116_s1, [#allocation4]  }
  0x89   :  { %94 = dma.done.wait [#allocation4], 256  }
  0x8a   :  { %95 = vsyncadd [#allocation4], 4294967040 }
  0x8b   :  { %47 = vsyncpa [#allocation3], 1 }
  0x8c   :  { %48 = vsyncpa [#allocation4], 1 }

</bundles_post_ra>
